<compile_context>
chip_gen: v7x
topology: tpu7x:2x2x1
jax: 0.10.0
libtpu: 0.0.40
codegen_flags: <defaults>
</compile_context>

<pallas_src>
import jax
import jax.numpy as jnp
from jax.experimental import pallas as pl
from jax.experimental.pallas import tpu as pltpu


# ----------------------------- hardware budget ---------------------------------


def _vmem_capacity_bytes():
    try:
        info = pltpu.get_tpu_info()
        cap = getattr(info, "vmem_capacity_bytes", None)
        if cap:
            return int(cap)
    except Exception:
        pass
    return 64 * 1024 * 1024  # conservative fallback (v7x per-core VMEM)


_VMEM_CAP = _vmem_capacity_bytes()
# Scoped-VMEM ceiling we let Mosaic use: ~3/4 of physical VMEM
#   v5e/v6e (128 MiB) -> 96 MiB, v7x (64 MiB) -> 48 MiB.
_VMEM_CEILING = max(32 * 1024 * 1024, (_VMEM_CAP * 3) // 4)
# Tile-sizing budget: leave headroom under the ceiling for compiler temporaries.
_VMEM_BUDGET = (_VMEM_CEILING * 7) // 8


# ------------------------------- kernels ----------------------------------------


def _linear_head_kernel(x_ref, w_ref, o_ref):
    # x: (TT, H), w: (1, H) lane-dense row  ->  o: (TT, 1)
    # nn.Linear(H, 1, bias=False) on the VPU (mul) + lane reduction; avoids a
    # degenerate 1-output-column MXU matmul.
    x = x_ref[...].astype(jnp.float32)
    w = w_ref[...].astype(jnp.float32)
    o_ref[...] = jnp.sum(x * w, axis=1, keepdims=True)


def _mlp_head_acc_kernel(x_ref, w1_ref, b1_ref, w2_ref, o_ref):
    # x-resident mode: grid = (B, T-tiles, H2-tiles); o block is resident across
    # the j (H2) axis and accumulates partial sums (exact: ReLU is elementwise
    # in H2 and the final projection is a sum over H2).
    @pl.when(pl.program_id(2) == 0)
    def _init():
        o_ref[...] = jnp.zeros_like(o_ref)

    h = jnp.dot(x_ref[...], w1_ref[...], preferred_element_type=jnp.float32)
    h = jnp.maximum(h + b1_ref[...].astype(jnp.float32), 0.0)
    # Second projection (2H -> 1) as VPU multiply + lane reduction in f32.
    o_ref[...] += jnp.sum(h * w2_ref[...].astype(jnp.float32), axis=1, keepdims=True)


def _mlp_head_partial_kernel(x_ref, w1_ref, b1_ref, w2_ref, o_ref):
    # w1-resident mode: grid = (H2-tiles, B, T-tiles); each step writes its own
    # partial output block, the wrapper sums over the H2-tile axis.
    h = jnp.dot(x_ref[...], w1_ref[...], preferred_element_type=jnp.float32)
    h = jnp.maximum(h + b1_ref[...].astype(jnp.float32), 0.0)
    o_ref[...] = jnp.sum(h * w2_ref[...].astype(jnp.float32), axis=1, keepdims=True)


# ---------------------------- tiling / planning ----------------------------------

_ROW_TILE_CANDS = (2048, 1024, 512, 256, 128, 64, 32, 16, 8)
_COL_TILE_CANDS = (4096, 2048, 1024, 512, 256, 128)


def _row_tiles(t, off, cap=None):
    """Row-tile candidates: multiples of 8 dividing t, aligned to `off`, desc."""
    out = []
    for c in _ROW_TILE_CANDS:
        if cap is not None and c > cap:
            continue
        if c <= t and t % c == 0 and off % c == 0:
            out.append(c)
    return out


def _col_tiles(h2, cap=None):
    """H2-tile candidates: full width first, then 128-multiples dividing h2."""
    cands = [h2]
    for c in _COL_TILE_CANDS:
        if c < h2 and h2 % c == 0:
            cands.append(c)
    if cap is not None:
        capped = [c for c in cands if c <= cap]
        if capped:
            cands = capped
    return cands


def _est_mlp_bytes(tt, tj, h, x_isize, w_isize):
    return (2 * tt * h * x_isize        # x tile, double-buffered
            + 2 * h * tj * w_isize      # w1 tile, double-buffered
            + 4 * tj * w_isize          # b1 + w2 tiles, double-buffered
            + 2 * tt * 4                # (TT, 1) f32 output block
            + 2 * tt * tj * 4)          # f32 MXU result + ReLU/product temporaries


def _est_linear_bytes(tt, h, x_isize, w_isize):
    return (2 * tt * h * x_isize        # x tile, double-buffered
            + 2 * h * w_isize           # weight row, double-buffered
            + 2 * tt * 4                # (TT, 1) f32 output block
            + 2 * tt * h * 4)           # f32 upcast + product temporaries


def _plan_linear(t_eff, off, h, x_isize, w_isize, budget, tt_cap):
    for tt in _row_tiles(t_eff, off, tt_cap):
        if _est_linear_bytes(tt, h, x_isize, w_isize) <= budget:
            return tt
    return None


def _plan_mlp(bsz, t_eff, off, h, h2, x_isize, w_isize, budget,
              tt_cap, col_cap, force_mode):
    n_rows = bsz * t_eff
    row_cands = _row_tiles(t_eff, off, tt_cap)
    col_cands = _col_tiles(h2, col_cap)
    if not row_cands or not col_cands:
        return None

    def best(prioritize_rows):
        outer = row_cands if prioritize_rows else col_cands
        inner = col_cands if prioritize_rows else row_cands
        for o in outer:
            for i in inner:
                tt, tj = (o, i) if prioritize_rows else (i, o)
                if _est_mlp_bytes(tt, tj, h, x_isize, w_isize) <= budget:
                    return (tt, tj)
        return None

    # x-resident: the biggest TT minimizes how often w1 is re-streamed from HBM.
    x_plan = best(prioritize_rows=True)
    # w1-resident: the biggest TJ minimizes how often x is re-streamed from HBM.
    w_plan = best(prioritize_rows=False)

    if force_mode == "x_resident":
        return None if x_plan is None else ("x_resident",) + x_plan
    if force_mode == "w_resident":
        return None if w_plan is None else ("w_resident",) + w_plan
    if x_plan is None and w_plan is None:
        return None

    # HBM-traffic model to pick the mode.
    w1_bytes = h * h2 * w_isize
    x_bytes = n_rows * h * x_isize
    traffic_x = traffic_w = None
    if x_plan is not None:
        traffic_x = x_bytes + (n_rows // x_plan[0]) * w1_bytes
    if w_plan is not None:
        nj = h2 // w_plan[1]
        traffic_w = w1_bytes + nj * x_bytes + nj * n_rows * 4
    if w_plan is not None and (x_plan is None or traffic_w <= traffic_x):
        return ("w_resident",) + w_plan
    return ("x_resident",) + x_plan


def _compiler_params(semantics, est_bytes):
    kwargs = dict(dimension_semantics=semantics)
    # Only raise the scoped-VMEM limit when the tiles actually need it; include
    # the f32 intermediates already counted in est_bytes and stay under the
    # per-generation ceiling (critical on v7x's 64 MiB physical VMEM).
    if est_bytes > 12 * 1024 * 1024:
        kwargs["vmem_limit_bytes"] = int(
            min(max(est_bytes * 5 // 4 + (4 << 20), 32 << 20), _VMEM_CEILING))
    return pltpu.CompilerParams(**kwargs)


# ------------------------------ pallas_call wrappers ------------------------------


def _linear_call(x3d, off_blk, t_eff, w, tt, est):
    bsz, _, h = x3d.shape
    nt = t_eff // tt
    n_rows = bsz * t_eff
    return pl.pallas_call(
        _linear_head_kernel,
        out_shape=jax.ShapeDtypeStruct((n_rows, 1), jnp.float32),
        grid_spec=pltpu.PrefetchScalarGridSpec(
            num_scalar_prefetch=0,
            grid=(bsz, nt),
            in_specs=[
                pl.BlockSpec((None, tt, h), lambda bi, ti: (bi, off_blk + ti, 0)),
                pl.BlockSpec((1, h), lambda bi, ti: (0, 0)),
            ],
            out_specs=pl.BlockSpec((tt, 1), lambda bi, ti: (bi * nt + ti, 0)),
        ),
        compiler_params=_compiler_params(("parallel", "parallel"), est),
    )(x3d, w)


def _mlp_x_resident_call(x3d, off_blk, t_eff, params, tt, tj, est):
    w1, b1, w2 = params
    bsz, _, h = x3d.shape
    h2 = w1.shape[1]
    nt = t_eff // tt
    nj = h2 // tj
    n_rows = bsz * t_eff
    return pl.pallas_call(
        _mlp_head_acc_kernel,
        out_shape=jax.ShapeDtypeStruct((n_rows, 1), jnp.float32),
        grid_spec=pltpu.PrefetchScalarGridSpec(
            num_scalar_prefetch=0,
            grid=(bsz, nt, nj),
            in_specs=[
                # x tile is constant along j (j innermost) -> fetched once per
                # (b, t) tile and reused for every H2 tile.
                pl.BlockSpec((None, tt, h), lambda bi, ti, ji: (bi, off_blk + ti, 0)),
                pl.BlockSpec((h, tj), lambda bi, ti, ji: (0, ji)),
                pl.BlockSpec((1, tj), lambda bi, ti, ji: (0, ji)),
                pl.BlockSpec((1, tj), lambda bi, ti, ji: (0, ji)),
            ],
            # Output block is resident across the (arbitrary) j axis -> accumulator.
            out_specs=pl.BlockSpec((tt, 1), lambda bi, ti, ji: (bi * nt + ti, 0)),
        ),
        compiler_params=_compiler_params(("parallel", "parallel", "arbitrary"), est),
    )(x3d, w1, b1, w2)


def _mlp_w_resident_call(x3d, off_blk, t_eff, params, tt, tj, est):
    w1, b1, w2 = params
    bsz, _, h = x3d.shape
    h2 = w1.shape[1]
    nt = t_eff // tt
    nj = h2 // tj
    rows_per_j = bsz * t_eff
    # TODO(synk): if DMA latency is exposed at j-tile boundaries, add
    # pipeline_mode=pl.Buffered(3) on the w1 BlockSpec (budget permitting).
    out = pl.pallas_call(
        _mlp_head_partial_kernel,
        out_shape=jax.ShapeDtypeStruct((nj * rows_per_j, 1), jnp.float32),
        grid_spec=pltpu.PrefetchScalarGridSpec(
            num_scalar_prefetch=0,
            grid=(nj, bsz, nt),
            in_specs=[
                pl.BlockSpec((None, tt, h), lambda ji, bi, ti: (bi, off_blk + ti, 0)),
                # w1's block index is constant across the inner (b, t) loop
                # (j is outermost) -> each j-tile is DMA'd exactly once and the
                # whole w1 makes a single pass over HBM.
                pl.BlockSpec((h, tj), lambda ji, bi, ti: (0, ji)),
                pl.BlockSpec((1, tj), lambda ji, bi, ti: (0, ji)),
                pl.BlockSpec((1, tj), lambda ji, bi, ti: (0, ji)),
            ],
            out_specs=pl.BlockSpec(
                (tt, 1), lambda ji, bi, ti: (ji * (bsz * nt) + bi * nt + ti, 0)),
        ),
        compiler_params=_compiler_params(("parallel", "parallel", "parallel"), est),
    )(x3d, w1, b1, w2)
    # Exact: ReLU is elementwise in H2, so partial sums over disjoint H2 tiles add up.
    return out.reshape(nj, rows_per_j).sum(axis=0).reshape(rows_per_j, 1)


# ---------------------------------- wrapper ---------------------------------------


def lm_critic_values(hidden, score_params, *, max_gen_len, mlp_head,
                     mlp_mode=None, max_row_tile=None, max_col_tile=None):
    """Value-head forward of LMCritic (return_terminal=False path).

    hidden:       (B, S, H) last-layer hidden states from the backbone LM.
    score_params: mlp_head=False -> (w,) with w (1, H)       (== Linear.weight)
                  mlp_head=True  -> (w1, b1, w2) with w1 (H, 2H) (== weight.T),
                                    b1 (1, 2H), w2 (1, 2H)   (== final weight)
    mlp_mode:     None (auto), "x_resident", or "w_resident" (testing knob).
    Returns (B, max_gen_len) float32 values.
    """
    B, S, H = hidden.shape
    T = max_gen_len
    assert S >= T
    off = S - T
    x_isize = jnp.dtype(hidden.dtype).itemsize

    # Two-TensorCore guard (v7x): keep >= 2 programs on the parallel (B, T-tile)
    # axes when B == 1; near-free on the single-TC v5e/v6e chips.
    tt_cap = max_row_tile
    if B == 1 and T >= 16:
        tt_cap = (T // 2) if tt_cap is None else min(tt_cap, T // 2)

    def plan(off_, t_):
        if not mlp_head:
            (w,) = score_params
            w_isize = jnp.dtype(w.dtype).itemsize
            tt = _plan_linear(t_, off_, H, x_isize, w_isize, _VMEM_BUDGET, tt_cap)
            if tt is None:
                return None
            return ("linear", tt, None, _est_linear_bytes(tt, H, x_isize, w_isize))
        w1, _, _ = score_params
        h2 = w1.shape[1]
        w_isize = jnp.dtype(w1.dtype).itemsize
        p = _plan_mlp(B, t_, off_, H, h2, x_isize, w_isize, _VMEM_BUDGET,
                      tt_cap, max_col_tile, mlp_mode)
        if p is None:
            return None
        mode, tt, tj = p
        return (mode, tt, tj, _est_mlp_bytes(tt, tj, H, x_isize, w_isize))

    p = plan(off, T)
    if p is not None:
        x3d, off_eff, t_eff = hidden, off, T
    else:
        # TODO(synk): unaligned / ragged "-max_gen_len:" starts fall back to one
        # host-side slice + pad (a (B, T, H) copy); a pl.Element offset on the S
        # axis would avoid even that.
        t_pad = ((T + 7) // 8) * 8
        x3d = hidden[:, off:, :]
        if t_pad != T:
            x3d = jnp.pad(x3d, ((0, 0), (0, t_pad - T), (0, 0)))
        off_eff, t_eff = 0, t_pad
        p = plan(0, t_pad)
        if p is None:
            raise ValueError("could not find a VMEM-feasible tiling for LMCritic head")

    mode, tt, tj, est = p
    off_blk = off_eff // tt
    if mode == "linear":
        (w,) = score_params
        out = _linear_call(x3d, off_blk, t_eff, w, tt, est)
    elif mode == "x_resident":
        out = _mlp_x_resident_call(x3d, off_blk, t_eff, score_params, tt, tj, est)
    else:
        out = _mlp_w_resident_call(x3d, off_blk, t_eff, score_params, tt, tj, est)

    # TODO(synk): optional lane-dense (1, TT) output blocks (in-kernel transpose)
    # would remove the masked (TT, 1) stores; single-digit % at most here.
    return out.reshape(B, t_eff)[:, :T].astype(jnp.float32)


# --------------------------- reference (plain JAX) ---------------------------------


def _reference(hidden, score_params, *, max_gen_len, mlp_head):
    B, S, H = hidden.shape
    x = hidden[:, S - max_gen_len:, :].astype(jnp.float32).reshape(-1, H)
    if mlp_head:
        w1, b1, w2 = score_params
        h = jnp.maximum(x @ w1.astype(jnp.float32) + b1.astype(jnp.float32), 0.0)
        v = jnp.sum(h * w2.astype(jnp.float32), axis=-1)
    else:
        (w,) = score_params
        v = jnp.sum(x * w.astype(jnp.float32), axis=-1)
    return v.reshape(B, max_gen_len)


# ------------------------------------ main ------------------------------------------


if __name__ == "__main__":
    def run_case(key, B, S, T, H, tol=1e-5, **kw):
        k_h, k_w1, k_b1, k_w2, k_w = jax.random.split(key, 5)
        H2 = 2 * H
        hidden = jax.random.normal(k_h, (B, S, H), dtype=jnp.float32)
        # Score-head params in "math" layout (see lm_critic_values docstring).
        w1 = jax.random.normal(k_w1, (H, H2), jnp.float32) / jnp.sqrt(H)
        b1 = jax.random.normal(k_b1, (1, H2), jnp.float32) * 0.01
        w2 = jax.random.normal(k_w2, (1, H2), jnp.float32) / jnp.sqrt(H2)
        w = jax.random.normal(k_w, (1, H), jnp.float32) / jnp.sqrt(H)

        v_mlp = jax.block_until_ready(
            lm_critic_values(hidden, (w1, b1, w2), max_gen_len=T, mlp_head=True, **kw))
        v_lin = jax.block_until_ready(
            lm_critic_values(hidden, (w,), max_gen_len=T, mlp_head=False, **kw))

        r_mlp = _reference(hidden, (w1, b1, w2), max_gen_len=T, mlp_head=True)
        r_lin = _reference(hidden, (w,), max_gen_len=T, mlp_head=False)

        assert v_mlp.shape == (B, T) and v_mlp.dtype == jnp.float32
        assert v_lin.shape == (B, T) and v_lin.dtype == jnp.float32
        assert jnp.allclose(v_mlp, r_mlp, atol=tol, rtol=tol)
        assert jnp.allclose(v_lin, r_lin, atol=tol, rtol=tol)

    key = jax.random.PRNGKey(0)
    k1, k2, k3, k4 = jax.random.split(key, 4)
    # 1) block-aligned fast path (no host-side copy); auto mode -> w1-resident, nj=1.
    run_case(k1, B=2, S=16, T=8, H=32)
    # 2) unaligned "-max_gen_len:" start -> host-slice fallback path.
    run_case(k2, B=2, S=12, T=8, H=32)
    # 3) multi-tile grid, x-resident accumulator path (2 row tiles x 2 H2 tiles).
    run_case(k3, B=2, S=48, T=32, H=128, tol=1e-4,
             mlp_mode="x_resident", max_col_tile=128)
    # 4) multi-tile grid, w1-resident partial-sum path (j outermost, wrapper sum).
    run_case(k4, B=2, S=48, T=32, H=128, tol=1e-4,
             mlp_mode="w_resident", max_col_tile=128, max_row_tile=8)

    print("KERNEL_OK")
</pallas_src>

<mosaic_0001>
module attributes {stable_mosaic.version = 11 : i64} {
  func.func @_mlp_head_partial_kernel(%arg0: i32, %arg1: i32, %arg2: i32, %arg3: memref<1x8x32xf32, #tpu.memory_space<vmem>>, %arg4: memref<32x64xf32, #tpu.memory_space<vmem>>, %arg5: memref<1x64xf32, #tpu.memory_space<vmem>>, %arg6: memref<1x64xf32, #tpu.memory_space<vmem>>, %arg7: memref<8x1xf32, #tpu.memory_space<vmem>>) attributes {dimension_semantics = [#tpu.dimension_semantics<parallel>, #tpu.dimension_semantics<parallel>, #tpu.dimension_semantics<parallel>], iteration_bounds = array<i64: 1, 2, 1>, scalar_prefetch = 0 : i64, scratch_operands = 0 : i64, tpu.core_type = #tpu.core_type<tc>, window_params = [{transform_indices = @transform_0, window_bounds = array<i64: 1, 8, 32>}, {transform_indices = @transform_1, window_bounds = array<i64: 32, 64>}, {transform_indices = @transform_2, window_bounds = array<i64: 1, 64>}, {transform_indices = @transform_3, window_bounds = array<i64: 1, 64>}, {transform_indices = @transform_4, window_bounds = array<i64: 8, 1>}]} {
    %c0 = arith.constant 0 : index
    %c0_0 = arith.constant 0 : index
    %c0_1 = arith.constant 0 : index
    %0 = vector.load %arg3[%c0, %c0_0, %c0_1] : memref<1x8x32xf32, #tpu.memory_space<vmem>>, vector<1x8x32xf32>
    %1 = vector.shape_cast %0 : vector<1x8x32xf32> to vector<8x32xf32>
    %c0_2 = arith.constant 0 : index
    %c0_3 = arith.constant 0 : index
    %2 = vector.load %arg4[%c0_2, %c0_3] : memref<32x64xf32, #tpu.memory_space<vmem>>, vector<32x64xf32>
    %cst = arith.constant dense<0.000000e+00> : vector<8x64xf32>
    %3 = tpu.matmul %1, %2, %cst {dimension_numbers = #tpu.dot_dimension_numbers<[1], [0], [0], [1], [0, 0, 1, 1], [], []>} : vector<8x32xf32>, vector<32x64xf32>, vector<8x64xf32> -> vector<8x64xf32>
    %c0_4 = arith.constant 0 : index
    %c0_5 = arith.constant 0 : index
    %4 = vector.load %arg5[%c0_4, %c0_5] : memref<1x64xf32, #tpu.memory_space<vmem>>, vector<1x64xf32>
    %5 = vector.broadcast %4 : vector<1x64xf32> to vector<8x64xf32>
    %6 = arith.addf %3, %5 : vector<8x64xf32>
    %cst_6 = arith.constant 0.000000e+00 : f32
    %7 = vector.broadcast %cst_6 : f32 to vector<8x64xf32>
    %8 = arith.maximumf %6, %7 : vector<8x64xf32>
    %c0_7 = arith.constant 0 : index
    %c0_8 = arith.constant 0 : index
    %9 = vector.load %arg6[%c0_7, %c0_8] : memref<1x64xf32, #tpu.memory_space<vmem>>, vector<1x64xf32>
    %10 = vector.broadcast %9 : vector<1x64xf32> to vector<8x64xf32>
    %11 = arith.mulf %8, %10 : vector<8x64xf32>
    %cst_9 = arith.constant dense<0.000000e+00> : vector<8xf32>
    %12 = vector.multi_reduction <add>, %11, %cst_9 [1] : vector<8x64xf32> to vector<8xf32>
    %13 = vector.shape_cast %12 : vector<8xf32> to vector<8x1xf32>
    %c0_10 = arith.constant 0 : index
    %c0_11 = arith.constant 0 : index
    %14 = vector.load %arg7[%c0_10, %c0_11] : memref<8x1xf32, #tpu.memory_space<vmem>>, vector<8x1xf32>
    tpu.vector_store %arg7[%c0_10, %c0_11], %13 {strides = array<i32>} : memref<8x1xf32, #tpu.memory_space<vmem>>, vector<8x1xf32>,
    return
  }
  func.func @transform_0(%arg0: i32, %arg1: i32, %arg2: i32) -> (i32, i32, i32) {
    %c1_i32 = arith.constant 1 : i32
    %0 = arith.addi %c1_i32, %arg2 : i32
    %c0_i32 = arith.constant 0 : i32
    %c0_i32_0 = arith.constant 0 : i32
    return %arg1, %0, %c0_i32 : i32, i32, i32
  }
  func.func @transform_1(%arg0: i32, %arg1: i32, %arg2: i32) -> (i32, i32) {
    %c0_i32 = arith.constant 0 : i32
    %c0_i32_0 = arith.constant 0 : i32
    return %c0_i32, %arg0 : i32, i32
  }
  func.func @transform_2(%arg0: i32, %arg1: i32, %arg2: i32) -> (i32, i32) {
    %c0_i32 = arith.constant 0 : i32
    %c0_i32_0 = arith.constant 0 : i32
    return %c0_i32, %arg0 : i32, i32
  }
  func.func @transform_3(%arg0: i32, %arg1: i32, %arg2: i32) -> (i32, i32) {
    %c0_i32 = arith.constant 0 : i32
    %c0_i32_0 = arith.constant 0 : i32
    return %c0_i32, %arg0 : i32, i32
  }
  func.func @transform_4(%arg0: i32, %arg1: i32, %arg2: i32) -> (i32, i32) {
    %c2_i32 = arith.constant 2 : i32
    %0 = arith.muli %arg0, %c2_i32 : i32
    %c1_i32 = arith.constant 1 : i32
    %1 = arith.muli %arg1, %c1_i32 : i32
    %2 = arith.addi %0, %1 : i32
    %3 = arith.addi %2, %arg2 : i32
    %c0_i32 = arith.constant 0 : i32
    %c0_i32_0 = arith.constant 0 : i32
    return %3, %c0_i32 : i32, i32
  }
}

</mosaic_0001>

<bundles_post_ra>
// kernel: tpu_custom_call.1
= control target key start
LH: loop header
LB: loop body
LE: loop exit
PB: predicated region body
PF: predicated region fallthrough
CT: control target
= control target key end

     0   :  { %9 = vsyncpa [#allocation3], 0  ;;  %s956_s0 = inlined_call_operand.hbm [shape: f32[2,16,32], index: 0, kind: input, shape index: {}]   ;;  %s957_s1 = inlined_call_operand.hbm [shape: f32[32,64], index: 1, kind: input, shape index: {}]   ;;  %s958_s2 = inlined_call_operand.vmem [shape: f32[1,64], index: 2, kind: input, shape index: {}]   ;;  %s959_s3 = inlined_call_operand.vmem [shape: f32[1,64], index: 3, kind: input, shape index: {}]   ;;  %s960_s4 = inlined_call_operand.vmem [shape: f32[16,1], index: 4, kind: output, shape index: {}]  }
   0x1   :  { %11 = vsyncpa [#allocation3 + $0x1], 0 }
   0x2   :  { %12 = vsyncpa [#allocation5], 0  ;;  %s790_s15 = smov 0   ;;  %s792_s16 = smov 0  }
   0x3   :  { %s794_s17 = smov 0   ;;  %s796_s18 = smov 0  }
   0x4   :  { %s798_s19 = smov 0   ;;  %s800_s20 = smov 0  }
   0x5 LB: > { %s530_s21 = sadd.s32 4294967295, %s756_s20   ;;  %p61_p0 = scmp.ne.s32.totalorder %s740_s16, %s736_s15  ;;  %s756_s20 = sphi %s800_s20, %s18_s20   ;;  %s752_s19 = sphi %s798_s19, %s978_s19   ;;  %s748_s18 = sphi %s796_s18, %s977_s18   ;;  %s744_s17 = sphi %s794_s17, %s976_s17   ;;  %s740_s16 = sphi %s792_s16, %s975_s16   ;;  %s736_s15 = sphi %s790_s15, %s974_s15  }
   0x6   : > { %p820_p1 = scmp.eq.s32.totalorder %s530_s21, 0  ;;  %p532_p2 = scmp.ge.s32.totalorder %s756_s20, 1 }
   0x7   : > { %p182_p3 = scmp.lt.s32.totalorder %s756_s20, 3  ;;  %s758_s25 = smov [#allocation4]  }
   0x8   : > { %s965_s22 = scalar_select %p820_p1, 1, 0 }
   0x9   : > { %p828_p4 = por %p820_p1, %p61_p0  ;;  %p832_p5 = pnand %p532_p2, %p182_p3 }
   0xa   : > { %s196_s26 = sshll.u32 %s758_s25, 4  ;;  %s33_s28 = sadd.s32 1, %s752_s19  ;;  %s197_s26 = int_to_ptr.vmem [resolvable:$true] %s196_s26 }
   0xb   : > { %s966_s23 = scalar_select %p828_p4, 1, 0 }
   0xc   : > { %s967_s24 = scalar_select %p832_p5, 1, 0 }
   0xd   : > { %p578_p6 = pneg %p832_p5  ;;  %s643_s5 = scalar_lea.hbm %s957_s1, 512 }
   0xe   : > { %p644_p8 = scmp.ne.s32.totalorder %s957_s1, %s643_s5  ;;  %p650_p12 = scmp.lt.u32.totalorder %s643_s5, %s957_s1 }
   0xf   : > { %p840_p7 = pnand %p578_p6, %p820_p1 }
  0x11   : > { %p645_p9 = pneg %p840_p7 }
  0x13   : > { %p646_p10 = pnand %p645_p9, %p644_p8 }
  0x15   : > { %p647_p11 = pneg %p646_p10 }
  0x17   : > { %p652_p13 = pnand %p650_p12, %p647_p11 }
  0x19   : > { %655 = shalt.err (!%p652_p13)
}
  0x1a   : > { %s656_s10 = scalar_lea.vmem %s197_s26, 512  ;;  %p664_p6 = scmp.lt.s32.totalorder %s197_s26, %s197_s26 }
  0x1b   : > { %p657_p0 = scmp.ne.s32.totalorder %s197_s26, %s656_s10  ;;  %p665_p1 = scmp.lt.s32.totalorder %s656_s10, %s656_s10 }
  0x1d   : > { %p659_p2 = pnand %p657_p0, %p645_p9  ;;  %p666_p4 = por %p665_p1, %p664_p6 }
  0x1f   : > { %p660_p3 = pneg %p659_p2 }
  0x21   : > { %p667_p5 = pnand %p666_p4, %p660_p3 }
  0x23   : > { %670 = shalt.err (!%p667_p5)
}
  0x24   : > { %s759_s11 = smov 128   ;;  %s760_s12 = smov 8  }
  0x25   : > { %581 = dma.hbm_to_vmem [thread:$0]  (!%p840_p7), %s957_s1, 512, %s197_s26, [#allocation5], %s759_s11, %s759_s11, %s760_s12  }
  0x26   : > { %p35_p1 = scmp.ge.s32.totalorder %s33_s28, 2  ;;  %s48_s15 = sadd.s32 1, %s744_s17 }
  0x27   : > { %p55_p4 = scmp.ne.s32.totalorder %s744_s17, %s740_s16  ;;  %p56_p5 = scmp.eq.s32.totalorder %s756_s20, 0 }
  0x28   : > { %s980_s28 = smov (%p35_p1, %s33_s28), 0  ;;  %p587_p9 = scmp.lt.s32.totalorder %s756_s20, 2 }
  0x29   : > { %p867_p8 = por %p56_p5, %p55_p4  ;;  %s43_s25 = ssub.s32 %s752_s19, %s980_s28 }
  0x2a   : > { %s222_s29 = sand.u32 1, %s744_s17   ;;  %p46_p10 = scmp.eq.s32.totalorder %s43_s25, 0 }
  0x2b   : > { %s537_s27 = sshll.u32 %s222_s29, 3  ;;  %s549_s30 = sshll.u32 %s752_s19, 8 }
  0x2c   : > { %s877_s5 = scalar_select %p46_p10, %s744_s17, %s48_s15  }
  0x2d   : > { %s448_s7 = scalar_lea.hbm %s956_s0, %s549_s30  ;;  %s226_s9 = scalar_lea.vmem [#allocation2], %s537_s27 }
  0x2e   : > { %s882_s8 = scalar_lea.hbm %s448_s7, 128  ;;  %s236_s10 = sshll.u32 %s226_s9, 4  ;;  %s884_s10 = int_to_ptr.vmem [resolvable:$true] %s236_s10 }
  0x2f   : > { %p888_p7 = pnand %p587_p9, %p867_p8  ;;  %s223_s12 = scalar_lea.sflag [#allocation3], %s222_s29 }
  0x30   : > { %s701_s13 = scalar_lea.hbm %s448_s7, 256  ;;  %s676_s25 = scalar_lea.hbm %s956_s0, 512 }
  0x31   : > { %p672_p11 = scmp.ne.s32.totalorder %s882_s8, %s701_s13  ;;  %p673_p12 = pneg %p888_p7 }
  0x32   : > { %p677_p2 = scmp.lt.u32.totalorder %s882_s8, %s956_s0  ;;  %p678_p3 = scmp.lt.u32.totalorder %s676_s25, %s701_s13 }
  0x33   : > { %p674_p13 = pnand %p673_p12, %p672_p11  ;;  %p680_p1 = scmp.lt.u32.totalorder %s701_s13, %s882_s8 }
  0x34   : > { %p679_p6 = por %p678_p3, %p677_p2 }
  0x35   : > { %p675_p0 = pneg %p674_p13 }
  0x36   : > { %p681_p4 = por %p680_p1, %p679_p6 }
  0x38   : > { %p682_p5 = pnand %p681_p4, %p675_p0 }
  0x3a   : > { %685 = shalt.err (!%p682_p5)
}
  0x3b   : > { %s686_s29 = scalar_lea.vmem %s884_s10, 128  ;;  %s761_s30 = smov [#allocation2]  }
  0x3c   : > { %p687_p8 = scmp.ne.s32.totalorder %s884_s10, %s686_s29  ;;  %s691_s26 = sshll.u32 %s761_s30, 4  ;;  %s692_s26 = int_to_ptr.vmem [resolvable:$false] %s691_s26 }
  0x3d   : > { %s693_s6 = scalar_lea.vmem %s692_s26, 256  ;;  %p694_p11 = scmp.lt.s32.totalorder %s884_s10, %s692_s26 }
  0x3e   : > { %p689_p9 = pnand %p687_p8, %p673_p12  ;;  %p695_p13 = scmp.lt.s32.totalorder %s693_s6, %s686_s29 }
  0x40   : > { %p690_p10 = pneg %p689_p9  ;;  %p696_p2 = por %p695_p13, %p694_p11 }
  0x42   : > { %p697_p3 = pnand %p696_p2, %p690_p10 }
  0x44   : > { %700 = shalt.err (!%p697_p3)
}
  0x45   : > { %585 = dma.hbm_to_vmem [thread:$0]  (!%p888_p7), %s882_s8, 128, %s884_s10, %s223_s12  }
  0x46   : > { %p971_p0 = scmp.ne.s32.totalorder %s967_s24, 0 }
  0x47   : > { %s247_s7 = sand.u32 (!%p971_p0), 1, %s740_s16   ;;  %p972_p12 = scmp.ne.s32.totalorder (!%p971_p0), %s966_s23, 0 }
  0x48   : > { %245 = sbr.rel (%p971_p0) target bundleno = 456 (0x1c8), region = 36  ;;  %s541_s9 = sshll.u32 (!%p971_p0), %s247_s7, 3 }
  0x49   : > { %s248_s13 = scalar_lea.sflag (!%p971_p0), [#allocation3], %s247_s7  ;;  %s251_s14 = scalar_lea.vmem (!%p971_p0), [#allocation2], %s541_s9 }
  0x4f   : > { %727 = dma.done.wait (%p972_p12), %s248_s13, 128  }
  0x50   : > { %729 = vsyncadd (%p972_p12), %s248_s13, 4294967168  ;;  %p973_p6 = scmp.ne.s32.totalorder %s965_s22, 0 }
  0x52   : > { %731 = dma.done.wait (%p973_p6), [#allocation5], 512  }
  0x53   : > { %733 = vsyncadd (%p973_p6), [#allocation5], 4294966784  ;;  %v762_v0 = vmov 0.0|0.0   ;;  %vm763_vm0 = vmmov 0   ;;  %v764_v1 = vmov 0.0   ;;  %v306_v2 = vld [vmem:[#allocation4] sm:$0xff] }
  0x54   : > { %566 = vmatprep.subr.bf16.mxu0 %v762_v0  ;;  %563 = vmatprep.mubr.msk.f32.mxu0 %vm763_vm0, %v764_v1  ;;  %v307_v3 = vld [vmem:[#allocation4 + $0x8] sm:$0xff]  ;;  %v308_v4 = vld [vmem:[#allocation4 + $0x10] sm:$0xff]  ;;  %v309_v6 = vld [vmem:[#allocation4 + $0x18] sm:$0xff]  ;;  %vm317_vm1 = vcmask 261120   ;;  %vm400_vm2 = vcmask 523264   ;;  %p298_p7 = scmp.lt.s32.totalorder %s748_s18, 1 }
  0x55   : > { %v567_v5 = vpack.c.bf16 %v307_v3, %v306_v2  ;;  %v570_v7 = vpack.c.bf16 %v309_v6, %v308_v4  ;;  %v305_v8 = vld [vmem:[%s251_s14] sm:$0xff]  ;;  %v544_v9 = vld [vmem:[%s958_s2] ss:$0 sm:$0xff]  ;;  %vm404_vm3 = vcmask 7168  }
  0x56   : > { %v546_v13 = vld [vmem:[%s959_s3] ss:$0 sm:$0xff]  ;;  %s982_s18 = smov (!%p298_p7, %s748_s18), 1 }
  0x57   : > { %568 = vmatpush3.bf16.msra.mxu0 %v567_v5  ;;  %s543_s10 = sshll.u32 %s982_s18, 3 }
  0x58   : > { %569 = vmatprep.subr.bf16.mxu0 %v762_v0  ;;  %s301_s15 = scalar_lea.vmem %s960_s4, %s543_s10 }
  0x5b   : > { %571 = vmatpush3.bf16.msra.mxu0 %v570_v7 }
  0x5e   : > { %564 = vmatmul.mubr.msk.f32.vlgmr.msra.gmra.mrb[0].mxu0 %vm317_vm1, %v305_v8 }
 0x131   : > { %v387_v10 = vpop.f32.mrb[0].mxu0 }
 0x132   : > { %v388_v11 = vadd.f32 %v544_v9, %v387_v10  ;;  %v565_v12 = vpop.f32.mrb[1].mxu0 }
 0x134   : > { %v391_v14 = vmax.f32 %v388_v11, 0.0 }
 0x136   : > { %v399_v15 = vmul.f32 %v546_v13, %v391_v14 }
 0x138   : > { %v401_v16 = vsel %vm400_vm2, %v399_v15, 0.0 }
 0x139   : > { %402 = vadd.xlane.f32.xlu0 %v401_v16 }
 0x1c6   : > { %v403_v17 = vpop.xlane.xlu0 %402 }
 0x1c7   : > { %405 = vst.msk [vmem:[%s301_s15] sm:$0xff] %vm404_vm3, %v403_v17 }
 0x1c8 PF: > { %s18_s20 = sadd.s32 1, %s756_s20   ;;  %s974_s15 = smov %s740_s16 }
 0x1c9   : > { %p15_p1 = scmp.ge.s32.totalorder %s18_s20, 4   ;;  %s975_s16 = smov %s744_s17 }
 0x1ca   : > { %s976_s17 = smov %s877_s5  ;;  %s977_s18 = smov %s752_s19 }
 0x1cb   : > { %s978_s19 = smov %s980_s28  ;;  %17 = sbr.rel (!%p15_p1) target bundleno = 5 (0x5), region = 87 }
 0x1d2   :  { %434 = vsyncpa [#allocation3], 1 }
 0x1d3   :  { %436 = vsyncpa [#allocation3 + $0x1], 1 }
 0x1d4   :  { %437 = vsyncpa [#allocation5], 1 }

</bundles_post_ra>
